<compile_context>
chip_gen: v6e
topology: v6e:2x2x1
jax: 0.10.0
libtpu: 0.0.40
codegen_flags: <defaults>
</compile_context>

<pallas_src>
import jax
import jax.numpy as jnp
from jax.experimental import pallas as pl
from jax.experimental.pallas import tpu as pltpu


def _round_up(x: int, m: int) -> int:
    return ((x + m - 1) // m) * m


def _default_elementwise_dtype():
    """bf16 elementwise on v6e/v7x (native bf16 VPU/EUP); f32 on v5e and unknown."""
    try:
        kind = jax.devices()[0].device_kind.lower()
    except Exception:
        return jnp.float32
    if ("v6" in kind) or ("v7" in kind):
        return jnp.bfloat16
    return jnp.float32


def _make_attention2_kernel(ew_dtype):
    def attention2_kernel(x_ref, w1_ref, b1_ref, w2_ref, b2_ref, o_ref):
        # x_ref: (bm, D) f32 tile of flattened (batch, instance) rows.
        # Cast to bf16 in-kernel (VPU has huge slack) -> no extra HBM cast pass.
        xb = x_ref[...].astype(jnp.bfloat16)

        # Layer 1: bf16 MXU matmul, f32 accumulation, bias broadcast once.
        acc = (
            jnp.dot(xb, w1_ref[...], preferred_element_type=jnp.float32)
            + b1_ref[...]
        )  # (bm, H) f32

        # Tanh on the EUP; bf16 on v6e/v7x (halves EUP/VPU vreg count), f32 on v5e.
        h = jnp.tanh(acc.astype(ew_dtype))  # (bm, H)

        # Layer 2 on the otherwise-idle MXU: (bm, H) @ (H, 1), f32 accumulation.
        s = (
            jnp.dot(h.astype(jnp.bfloat16), w2_ref[...],
                    preferred_element_type=jnp.float32)
            + b2_ref[...]
        )  # (bm, 1) f32

        # Exact sigmoid (exp -> EUP slot); s is only (bm, 1) so this is negligible.
        o_ref[...] = 1.0 / (1.0 + jnp.exp(-s))

    return attention2_kernel


def attention2_forward(x, w1, b1, w2, b2, *, block_m=4096, elementwise_dtype=None):
    """x: (B, N, D); w1: (D, H); b1: (H,); w2: (H, 1); b2: (1,). Returns (B, N, 1) f32."""
    B, N, D = x.shape
    H = w1.shape[1]
    M = B * N

    if elementwise_dtype is None:
        elementwise_dtype = _default_elementwise_dtype()

    # Flatten only (free, contiguous).  No cast, no pad: the kernel casts and
    # Pallas clips the partial last block's output writes.
    xf = x.reshape(M, D)
    w1c = w1.astype(jnp.bfloat16)                       # (D, H), tiny, cast once
    b1r = b1.reshape(1, H).astype(jnp.float32)
    w2c = w2.reshape(H, 1).astype(jnp.bfloat16)         # column for MXU layer 2
    b2r = b2.reshape(1, 1).astype(jnp.float32)

    # Row-tile sizing from a VMEM budget that includes the f32 accumulator,
    # tanh temp, h and the layer-2 input (not just the x slabs).  16 MiB working
    # budget fits v5e's default scoped VMEM; vmem_limit_bytes below adds headroom.
    ew_bytes = jnp.dtype(elementwise_dtype).itemsize
    bytes_per_row = (
        2 * D * 4            # x: 2 pipeline buffers, f32
        + H * 4              # f32 accumulator
        + H * 4              # tanh temp
        + 2 * H * ew_bytes   # h + bf16 copy for layer-2 MXU
        + 2 * 4              # output double buffer
    )
    budget = 16 * 1024 * 1024
    bm_cap = max(8, (budget // bytes_per_row) // 8 * 8)

    bm = min(_round_up(block_m, 8), _round_up(M, 8), bm_cap)
    # Ensure >= 2 grid steps whenever M allows so v7x's two TensorCores both get
    # work on the "parallel" axis (one extra ~0.35us step elsewhere: negligible).
    if M > 8:
        bm = min(bm, _round_up(pl.cdiv(M, 2), 8))
    grid_m = pl.cdiv(M, bm)

    out = pl.pallas_call(
        _make_attention2_kernel(elementwise_dtype),
        out_shape=jax.ShapeDtypeStruct((M, 1), jnp.float32),
        grid_spec=pltpu.PrefetchScalarGridSpec(
            num_scalar_prefetch=0,
            grid=(grid_m,),
            in_specs=[
                pl.BlockSpec((bm, D), lambda i: (i, 0)),   # x row tile (f32)
                pl.BlockSpec((D, H), lambda i: (0, 0)),    # W1 (VMEM-resident, bf16)
                pl.BlockSpec((1, H), lambda i: (0, 0)),    # b1 (f32)
                pl.BlockSpec((H, 1), lambda i: (0, 0)),    # w2 column (bf16)
                pl.BlockSpec((1, 1), lambda i: (0, 0)),    # b2 (needed: sigmoid)
            ],
            out_specs=pl.BlockSpec((bm, 1), lambda i: (i, 0)),
        ),
        compiler_params=pltpu.CompilerParams(
            dimension_semantics=("parallel",),             # v7x: split tiles across TCs
            vmem_limit_bytes=32 * 1024 * 1024,             # headroom over the 16 MiB budget
        ),
    )(xf, w1c, b1r, w2c, b2r)

    return out.reshape(B, N, 1)


def attention2_reference_f32(x, w1, b1, w2, b2):
    B, N, D = x.shape
    xf = x.reshape(-1, D)
    h = jnp.tanh(xf @ w1 + b1[None, :])
    s = h @ w2.reshape(-1, 1) + b2.reshape(1, 1)
    return (1.0 / (1.0 + jnp.exp(-s))).reshape(B, N, 1)


def attention2_reference_matched(x, w1, b1, w2, b2, ew_dtype):
    """Mirrors the kernel's dtype path: bf16 matmul inputs, f32 accum, ew_dtype tanh."""
    B, N, D = x.shape
    xf = x.reshape(-1, D).astype(jnp.bfloat16)
    acc = jnp.dot(xf, w1.astype(jnp.bfloat16),
                  preferred_element_type=jnp.float32) + b1[None, :]
    h = jnp.tanh(acc.astype(ew_dtype))
    s = jnp.dot(h.astype(jnp.bfloat16), w2.astype(jnp.bfloat16).reshape(-1, 1),
                preferred_element_type=jnp.float32) + b2.reshape(1, 1)
    return (1.0 / (1.0 + jnp.exp(-s))).reshape(B, N, 1)


if __name__ == "__main__":
    B, N, D, H = 2, 8, 32, 128   # num_in=32 (module default), hidden=128

    key = jax.random.PRNGKey(0)
    kx, kw1, kb1, kw2, kb2 = jax.random.split(key, 5)

    # Deterministic synthetic parameters (PyTorch-Linear-style uniform fan-in init),
    # stored as (in, out) so the kernel does row-major x @ W.
    bound1 = 1.0 / float(jnp.sqrt(jnp.float32(D)))
    bound2 = 1.0 / float(jnp.sqrt(jnp.float32(H)))
    w1 = jax.random.uniform(kw1, (D, H), jnp.float32, -bound1, bound1)
    b1 = jax.random.uniform(kb1, (H,), jnp.float32, -bound1, bound1)
    w2 = jax.random.uniform(kw2, (H, 1), jnp.float32, -bound2, bound2)
    b2 = jax.random.uniform(kb2, (1,), jnp.float32, -bound2, bound2)

    x = jax.random.normal(kx, (B, N, D), jnp.float32)

    ew = _default_elementwise_dtype()
    out = jax.block_until_ready(attention2_forward(x, w1, b1, w2, b2))
    assert out.shape == (B, N, 1), out.shape

    # Precision-matched reference (same bf16 matmul inputs / elementwise dtype).
    ref_m = attention2_reference_matched(x, w1, b1, w2, b2, ew)
    err_m = float(jnp.max(jnp.abs(out - ref_m)))
    assert jnp.allclose(out, ref_m, atol=5e-3, rtol=0.0), err_m

    # Sanity check against the full-f32 reference (bf16 quantization error only).
    ref32 = attention2_reference_f32(x, w1, b1, w2, b2)
    err32 = float(jnp.max(jnp.abs(out - ref32)))
    assert jnp.allclose(out, ref32, atol=2e-2, rtol=0.0), err32

    # Sigmoid outputs are valid probabilities.
    assert bool(jnp.all((out >= 0.0) & (out <= 1.0)))

    print("KERNEL_OK")
</pallas_src>

<mosaic_0001>
module attributes {stable_mosaic.version = 11 : i64} {
  func.func @attention2_kernel(%arg0: i32, %arg1: memref<8x32xf32, #tpu.memory_space<vmem>>, %arg2: memref<32x128xbf16, #tpu.memory_space<vmem>>, %arg3: memref<1x128xf32, #tpu.memory_space<vmem>>, %arg4: memref<128x1xbf16, #tpu.memory_space<vmem>>, %arg5: memref<1x1xf32, #tpu.memory_space<vmem>>, %arg6: memref<8x1xf32, #tpu.memory_space<vmem>>) attributes {dimension_semantics = [#tpu.dimension_semantics<parallel>], iteration_bounds = array<i64: 2>, scalar_prefetch = 0 : i64, scratch_operands = 0 : i64, tpu.core_type = #tpu.core_type<tc>, window_params = [{transform_indices = @transform_0, window_bounds = array<i64: 8, 32>}, {pipeline_mode = #tpu.pipeline_mode<synchronous>, transform_indices = @transform_1, window_bounds = array<i64: 32, 128>}, {pipeline_mode = #tpu.pipeline_mode<synchronous>, transform_indices = @transform_2, window_bounds = array<i64: 1, 128>}, {pipeline_mode = #tpu.pipeline_mode<synchronous>, transform_indices = @transform_3, window_bounds = array<i64: 128, 1>}, {pipeline_mode = #tpu.pipeline_mode<synchronous>, transform_indices = @transform_4, window_bounds = array<i64: 1, 1>}, {transform_indices = @transform_5, window_bounds = array<i64: 8, 1>}]} {
    %c0 = arith.constant 0 : index
    %c0_0 = arith.constant 0 : index
    %0 = vector.load %arg1[%c0, %c0_0] : memref<8x32xf32, #tpu.memory_space<vmem>>, vector<8x32xf32>
    %1 = arith.truncf %0 : vector<8x32xf32> to vector<8x32xbf16>
    %c0_1 = arith.constant 0 : index
    %c0_2 = arith.constant 0 : index
    %2 = vector.load %arg2[%c0_1, %c0_2] : memref<32x128xbf16, #tpu.memory_space<vmem>>, vector<32x128xbf16>
    %cst = arith.constant dense<0.000000e+00> : vector<8x128xf32>
    %3 = tpu.matmul %1, %2, %cst {dimension_numbers = #tpu.dot_dimension_numbers<[1], [0], [0], [1], [0, 0, 1, 1], [], []>} : vector<8x32xbf16>, vector<32x128xbf16>, vector<8x128xf32> -> vector<8x128xf32>
    %c0_3 = arith.constant 0 : index
    %c0_4 = arith.constant 0 : index
    %4 = vector.load %arg3[%c0_3, %c0_4] : memref<1x128xf32, #tpu.memory_space<vmem>>, vector<1x128xf32>
    %5 = vector.broadcast %4 : vector<1x128xf32> to vector<8x128xf32>
    %6 = arith.addf %3, %5 : vector<8x128xf32>
    %7 = math.tanh %6 : vector<8x128xf32>
    %8 = arith.truncf %7 : vector<8x128xf32> to vector<8x128xbf16>
    %c0_5 = arith.constant 0 : index
    %c0_6 = arith.constant 0 : index
    %9 = vector.load %arg4[%c0_5, %c0_6] : memref<128x1xbf16, #tpu.memory_space<vmem>>, vector<128x1xbf16>
    %cst_7 = arith.constant dense<0.000000e+00> : vector<8x1xf32>
    %10 = tpu.matmul %8, %9, %cst_7 {dimension_numbers = #tpu.dot_dimension_numbers<[1], [0], [0], [1], [0, 0, 1, 1], [], []>} : vector<8x128xbf16>, vector<128x1xbf16>, vector<8x1xf32> -> vector<8x1xf32>
    %c0_8 = arith.constant 0 : index
    %c0_9 = arith.constant 0 : index
    %11 = vector.load %arg5[%c0_8, %c0_9] : memref<1x1xf32, #tpu.memory_space<vmem>>, vector<1x1xf32>
    %12 = vector.broadcast %11 : vector<1x1xf32> to vector<8x1xf32>
    %13 = arith.addf %10, %12 : vector<8x1xf32>
    %cst_10 = arith.constant 0.000000e+00 : f32
    %14 = vector.broadcast %cst_10 : f32 to vector<8x1xf32>
    %15 = arith.subf %14, %13 : vector<8x1xf32>
    %16 = math.exp %15 : vector<8x1xf32>
    %cst_11 = arith.constant 1.000000e+00 : f32
    %17 = vector.broadcast %cst_11 : f32 to vector<8x1xf32>
    %18 = arith.addf %17, %16 : vector<8x1xf32>
    %cst_12 = arith.constant 1.000000e+00 : f32
    %19 = vector.broadcast %cst_12 : f32 to vector<8x1xf32>
    %20 = arith.divf %19, %18 : vector<8x1xf32>
    %c0_13 = arith.constant 0 : index
    %c0_14 = arith.constant 0 : index
    %21 = vector.load %arg6[%c0_13, %c0_14] : memref<8x1xf32, #tpu.memory_space<vmem>>, vector<8x1xf32>
    tpu.vector_store %arg6[%c0_13, %c0_14], %20 {strides = array<i32>} : memref<8x1xf32, #tpu.memory_space<vmem>>, vector<8x1xf32>,
    return
  }
  func.func @transform_0(%arg0: i32) -> (i32, i32) {
    %c0_i32 = arith.constant 0 : i32
    %c0_i32_0 = arith.constant 0 : i32
    return %arg0, %c0_i32 : i32, i32
  }
  func.func @transform_1(%arg0: i32) -> (i32, i32) {
    %c0_i32 = arith.constant 0 : i32
    %c0_i32_0 = arith.constant 0 : i32
    %c0_i32_1 = arith.constant 0 : i32
    return %c0_i32, %c0_i32_0 : i32, i32
  }
  func.func @transform_2(%arg0: i32) -> (i32, i32) {
    %c0_i32 = arith.constant 0 : i32
    %c0_i32_0 = arith.constant 0 : i32
    %c0_i32_1 = arith.constant 0 : i32
    return %c0_i32, %c0_i32_0 : i32, i32
  }
  func.func @transform_3(%arg0: i32) -> (i32, i32) {
    %c0_i32 = arith.constant 0 : i32
    %c0_i32_0 = arith.constant 0 : i32
    %c0_i32_1 = arith.constant 0 : i32
    return %c0_i32, %c0_i32_0 : i32, i32
  }
  func.func @transform_4(%arg0: i32) -> (i32, i32) {
    %c0_i32 = arith.constant 0 : i32
    %c0_i32_0 = arith.constant 0 : i32
    %c0_i32_1 = arith.constant 0 : i32
    return %c0_i32, %c0_i32_0 : i32, i32
  }
  func.func @transform_5(%arg0: i32) -> (i32, i32) {
    %c0_i32 = arith.constant 0 : i32
    %c0_i32_0 = arith.constant 0 : i32
    return %arg0, %c0_i32 : i32, i32
  }
}

</mosaic_0001>

<bundles_post_ra>
// kernel: tpu_custom_call.1
= control target key start
LH: loop header
LB: loop body
LE: loop exit
PB: predicated region body
PF: predicated region fallthrough
CT: control target
= control target key end

     0   :  { %s597_s20 = smov 0   ;;  %s654_s0 = inlined_call_operand.vmem [shape: f32[16,32], index: 0, kind: input, shape index: {}]   ;;  %s655_s1 = inlined_call_operand.vmem [shape: bf16[32,128], index: 1, kind: input, shape index: {}]   ;;  %s656_s2 = inlined_call_operand.vmem [shape: f32[1,128], index: 2, kind: input, shape index: {}]   ;;  %s657_s3 = inlined_call_operand.vmem [shape: bf16[128,1], index: 3, kind: input, shape index: {}]   ;;  %s658_s4 = inlined_call_operand.<no memory space> [shape: f32[1,1], index: 4, kind: input, shape index: {}]   ;;  %s659_s5 = inlined_call_operand.vmem [shape: f32[16,1], index: 5, kind: output, shape index: {}]  }
   0x1   :  { %v10_v0 = vstv %s658_s4 }
   0x2   :  { %11 = vst [vmem:[#allocation2] sm:$0x1] %v10_v0 }
   0x3 LB: > { %s466_s21 = sadd.s32 4294967295, %s560_s20   ;;  %p470_p0 = scmp.ge.s32.totalorder %s560_s20, 1  ;;  %s560_s20 = sphi %s597_s20, %s17_s20  }
   0x4   : > { %p188_p1 = scmp.lt.s32.totalorder %s560_s20, 3 }
   0x6   : > { %p189_p2 = pnand %p470_p0, %p188_p1 }
   0x7   : > { %p214_p3 = scmp.lt.s32.totalorder (!%p189_p2), %s466_s21, 1 }
   0x8   : > { %192 = sbr.rel (%p189_p2) target bundleno = 463 (0x1cf), region = 40 }
   0xd   : > { %v538_v1 = vld [vmem:[%s655_s1 + $0x8] sm:$0xff]   ;;  %v562_v2 = vmov 0.0   ;;  %v539_v3 = vld [vmem:[%s655_s1] sm:$0xff]   ;;  %vm563_vm0 = vmmov 0   ;;  %v540_v4 = vld [vmem:[%s657_s3 + $0x38] sm:$0xff]   ;;  %s661_s21 = smov (!%p214_p3, %s466_s21), 1 }
   0xe   : > { %500 = vmatprep.subr.bf16.mxu0 %v562_v2  ;;  %508 = vmatprep.subr.bf16.mxu1 %v562_v2  ;;  %v541_v5 = vld [vmem:[%s657_s3 + $0x30] sm:$0xff]   ;;  %s471_s29 = sshll.u32 %s661_s21, 3  ;;  %vm248_vm1 = vcmask 261120   ;;  %v542_v8 = vld [vmem:[%s657_s3 + $0x28] sm:$0xff]   ;;  %v543_v9 = vld [vmem:[%s657_s3 + $0x20] sm:$0xff]   ;;  %vm411_vm2 = vcmask 7168  }
   0xf   : > { %501 = vmatpush3.bf16.msra.mxu0 %v538_v1  ;;  %504 = vmatprep.mubr.msk.bf16.mxu0 %vm563_vm0, %v562_v2  ;;  %s217_s7 = scalar_lea.vmem %s654_s0, %s471_s29  ;;  %v544_v10 = vld [vmem:[%s657_s3 + $0x18] sm:$0xff]   ;;  %v545_v11 = vld [vmem:[%s657_s3 + $0x10] sm:$0xff]   ;;  %v546_v12 = vld [vmem:[%s657_s3 + $0x8] sm:$0xff]   ;;  %s221_s25 = scalar_lea.vmem %s659_s5, %s471_s29 }
  0x10   : > { %502 = vmatprep.subr.bf16.mxu0 %v562_v2  ;;  %524 = vmatprep.mubr.msk.bf16.mxu1 %vm563_vm0, %v562_v2  ;;  %v223_v6 = vld [vmem:[%s217_s7] sm:$0xff] }
  0x11   : > { %509 = vmatpush3.bf16.msra.mxu1 %v540_v4  ;;  %v224_v7 = vpack.c.bf16 %v223_v6, %v223_v6  ;;  %v547_v13 = vld [vmem:[%s657_s3] sm:$0xff]  }
  0x12   : > { %510 = vmatprep.subr.bf16.mxu1 %v562_v2  ;;  %v473_v14 = vld [vmem:[%s656_s2] ss:$0 sm:$0xff] }
  0x13   : > { %503 = vmatpush3.bf16.msra.mxu0 %v539_v3  ;;  %v477_v22 = vld [vmem:[#allocation2] ss:$0 sm:$0xff] }
  0x15   : > { %511 = vmatpush3.bf16.msra.mxu1 %v541_v5 }
  0x16   : > { %512 = vmatprep.subr.bf16.mxu1 %v562_v2  ;;  %505 = vmatmul.mubr.msk.bf16.vlgmr.msra.gmra.mxu0 %vm248_vm1, %v224_v7 }
  0x19   : > { %513 = vmatpush3.bf16.msra.mxu1 %v542_v8 }
  0x1a   : > { %514 = vmatprep.subr.bf16.mxu1 %v562_v2 }
  0x1d   : > { %515 = vmatpush3.bf16.msra.mxu1 %v543_v9 }
  0x1e   : > { %516 = vmatprep.subr.bf16.mxu1 %v562_v2 }
  0x21   : > { %517 = vmatpush3.bf16.msra.mxu1 %v544_v10 }
  0x22   : > { %518 = vmatprep.subr.bf16.mxu1 %v562_v2 }
  0x25   : > { %519 = vmatpush3.bf16.msra.mxu1 %v545_v11 }
  0x26   : > { %520 = vmatprep.subr.bf16.mxu1 %v562_v2 }
  0x29   : > { %521 = vmatpush3.bf16.msra.mxu1 %v546_v12 }
  0x2a   : > { %522 = vmatprep.subr.bf16.mxu1 %v562_v2 }
  0x2d   : > { %523 = vmatpush3.bf16.msra.mxu1 %v547_v13 }
  0xd6   : > { %v286_v15 = vpop.f32.mrf.mxu0 }
  0xd7   : > { %v287_v16 = vadd.f32 %v473_v14, %v286_v15 }
  0xd8   : > { %v506_v17 = vpop.f32.mrf.mxu0 }
  0xd9   : > { %548 = vtanh.f32 %v287_v16 }
  0xda   : > { %v289_v18 = vpop.f32.mrf.mxu0 }
  0xdc   : > { %v507_v19 = vpop.f32.mrf.mxu0 }
  0xe6   : > { %v549_v20 = vpop.eup %548 }
  0xe7   : > { %v293_v21 = vpack.c.bf16 %v549_v20, %v549_v20 }
  0xe9   : > { %525 = vmatmul.mubr.bf16.vlgmr.msra.gmra.mxu1 %v293_v21 }
 0x1a9   : > { %v399_v23 = vpop.f32.mrf.mxu1 }
 0x1aa   : > { %v400_v24 = vadd.f32 %v477_v22, %v399_v23 }
 0x1ab   : > { %v526_v25 = vpop.f32.mrf.mxu1 }
 0x1ac   : > { %v405_v26 = vsub.f32 0.0, %v400_v24 }
 0x1ad   : > { %v402_v27 = vpop.f32.mrf.mxu1 }
 0x1ae   : > { %v406_v28 = vmul.f32 1.442695, %v405_v26 }
 0x1af   : > { %v527_v29 = vpop.f32.mrf.mxu1 }
 0x1b0   : > { %550 = vpow2.f32 %v406_v28 }
 0x1bd   : > { %v551_v30 = vpop.eup %550 }
 0x1be   : > { %v408_v31 = vadd.f32 1.0, %v551_v30 }
 0x1c0   : > { %552 = vrcp.f32 %v408_v31 }
 0x1cd   : > { %v553_v32 = vpop.eup %552 }
 0x1ce   : > { %412 = vst.msk [vmem:[%s221_s25] sm:$0xff] %vm411_vm2, %v553_v32 }
 0x1cf PF: > { %s17_s20 = sadd.s32 1, %s560_s20  }
 0x1d0   : > { %p14_p4 = scmp.ge.s32.totalorder %s17_s20, 4  }
 0x1d2   :  { %16 = sbr.rel (!%p14_p4) target bundleno = 3 (0x3), region = 70 }

</bundles_post_ra>
